<compile_context>
chip_gen: v6e
topology: v6e:2x2x1
jax: 0.10.0
libtpu: 0.0.40
codegen_flags: <defaults>
</compile_context>

<pallas_src>
import functools

import jax
import jax.numpy as jnp
import numpy as np
from jax.experimental import pallas as pl
from jax.experimental.pallas import tpu as pltpu

EPS = 1e-5  # torch.nn.LayerNorm default eps


def multihead_kernel(x_ref, w_ref, s_ref, out_ref, *, num_head, L, D, H):
    # x_ref : (1, 3L, D)   rows [Q; K; V] for one batch element
    # w_ref : (D + H, 128) rows 0:D   = [wq*c | wk | wv]   (cols 0:3H)
    #                      rows D:D+H = wo                 (cols 0:E, zero-padded)
    # s_ref : (4, 128)     rows = gamma, beta, [bq*c|bk|bv], bo (zero-padded)
    x = x_ref[0].astype(jnp.float32)                        # (3L, D)

    # ---- single fused LayerNorm over the stacked [Q; K; V] rows ----
    gamma = s_ref[0:1, 0:D]                                 # (1, D)
    beta = s_ref[1:2, 0:D]                                  # (1, D)
    mean = jnp.mean(x, axis=-1, keepdims=True)
    var = jnp.mean(jnp.square(x - mean), axis=-1, keepdims=True)
    xn = (x - mean) * jax.lax.rsqrt(var + EPS) * gamma + beta   # (3L, D)

    # ---- fused Q/K/V projection: one MXU push ----
    w_all = w_ref[0:D, 0:3 * H]                             # (D, 3H)
    b_all = s_ref[2:3, 0:3 * H]                             # (1, 3H)
    proj = jnp.dot(xn, w_all, preferred_element_type=jnp.float32) + b_all  # (3L, 3H)

    Qp = proj[0:L, 0:H]              # already scaled by 1/sqrt(8) via wq, bq
    Kp = proj[L:2 * L, H:2 * H]
    Vp = proj[2 * L:3 * L, 2 * H:3 * H]

    hd = H // num_head
    E_pad = out_ref.shape[-1]
    acc = jnp.zeros((L, E_pad), jnp.float32)
    for h in range(num_head):                               # static unroll over heads
        lo, hi = h * hd, (h + 1) * hd
        Qh = Qp[:, lo:hi]                                   # (L, hd)
        Kh = Kp[:, lo:hi]
        Vh = Vp[:, lo:hi]
        # contract dim 1 of both operands -> no explicit Kh.T relayout
        s = jax.lax.dot_general(Qh, Kh, (((1,), (1,)), ((), ())),
                                preferred_element_type=jnp.float32)        # (L, L)
        s = s - jnp.max(s, axis=-1, keepdims=True)
        p = jnp.exp(s)
        p = p * pl.reciprocal(jnp.sum(p, axis=-1, keepdims=True), approx=True)
        oh = jnp.dot(p, Vh, preferred_element_type=jnp.float32)            # (L, hd)
        # accumulate the output projection per head (no head concat)
        acc = acc + jnp.dot(oh, w_ref[D + lo:D + hi, :],
                            preferred_element_type=jnp.float32)            # (L, E_pad)

    out = acc + s_ref[3:4, :]                               # + bo (zero-padded)
    # TODO(synk): Dropout(p=0.1) treated as identity (inference/eval mode).
    out_ref[0] = out.astype(out_ref.dtype)


def multihead_forward(Q, K, V, params, num_head):
    b, L, D = Q.shape
    H = params["wq"].shape[1]            # 32 (fc hidden)
    E = params["wo"].shape[1]            # embed_dim
    lane = 128                           # lane-dense parameter / output width
    assert 3 * H <= lane and E <= lane

    inv_scale = 1.0 / (8.0 ** 0.5)       # reference divides scores by 8**0.5

    # ---- host-side parameter packing: two 128-lane blobs ----
    w_all = jnp.concatenate(
        [params["wq"] * inv_scale, params["wk"], params["wv"]], axis=1)     # (D, 3H)
    w_all = jnp.pad(w_all, ((0, 0), (0, lane - 3 * H)))
    wo_p = jnp.pad(params["wo"], ((0, 0), (0, lane - E)))
    w_blob = jnp.concatenate([w_all, wo_p], axis=0).astype(jnp.float32)     # (D+H, 128)

    def _row(v):
        return jnp.pad(v, (0, lane - v.shape[0])).reshape(1, lane)

    b_all = jnp.concatenate(
        [params["bq"] * inv_scale, params["bk"], params["bv"]])             # (3H,)
    s_blob = jnp.concatenate(
        [_row(params["gamma"]), _row(params["beta"]), _row(b_all),
         _row(params["bo"])], axis=0).astype(jnp.float32)                   # (4, 128)

    # stack Q, K, V along the sequence (sublane) axis -> one activation input
    X = jnp.concatenate([Q, K, V], axis=1)                                  # (b, 3L, D)

    kernel = functools.partial(multihead_kernel, num_head=num_head, L=L, D=D, H=H)

    out = pl.pallas_call(
        kernel,
        out_shape=jax.ShapeDtypeStruct((b, L, lane), jnp.float32),
        grid=(b,),
        in_specs=[
            pl.BlockSpec((1, 3 * L, D), lambda i: (i, 0, 0)),   # stacked activations
            pl.BlockSpec((D + H, lane), lambda i: (0, 0)),      # weight blob
            pl.BlockSpec((4, lane), lambda i: (0, 0)),          # gamma/beta/bias blob
        ],
        out_specs=pl.BlockSpec((1, L, lane), lambda i: (i, 0, 0)),
        compiler_params=pltpu.CompilerParams(dimension_semantics=("parallel",)),
    )(X, w_blob, s_blob)
    return out[..., :E]                                                     # (b, L, E)


def multihead_reference(Q, K, V, params, num_head):
    """Pure-JAX reference matching the PyTorch forward (dropout as identity)."""
    def ln(x):
        mean = x.mean(-1, keepdims=True)
        var = ((x - mean) ** 2).mean(-1, keepdims=True)
        return (x - mean) / jnp.sqrt(var + EPS) * params["gamma"] + params["beta"]

    b, L, D = Q.shape
    Qp = ln(Q) @ params["wq"] + params["bq"]
    Kp = ln(K) @ params["wk"] + params["bk"]
    Vp = ln(V) @ params["wv"] + params["bv"]
    hd = Qp.shape[-1] // num_head
    Qh = Qp.reshape(b, L, num_head, hd).transpose(0, 2, 1, 3)
    Kh = Kp.reshape(b, L, num_head, hd).transpose(0, 2, 1, 3)
    Vh = Vp.reshape(b, L, num_head, hd).transpose(0, 2, 1, 3)
    s = jnp.einsum("bhld,bhmd->bhlm", Qh, Kh) / (8 ** 0.5)
    p = jax.nn.softmax(s, axis=-1)
    o = jnp.einsum("bhlm,bhmd->bhld", p, Vh)
    o = o.transpose(0, 2, 1, 3).reshape(b, L, num_head * hd)
    return o @ params["wo"] + params["bo"]


def init_params(key, input_dim, embed_dim, hidden=32):
    ks = jax.random.split(key, 8)

    def lin(kw, kb, fan_in, fan_out):
        bound = 1.0 / np.sqrt(fan_in)
        w = jax.random.uniform(kw, (fan_in, fan_out), jnp.float32, -bound, bound)
        b = jax.random.uniform(kb, (fan_out,), jnp.float32, -bound, bound)
        return w, b

    wq, bq = lin(ks[0], ks[1], input_dim, hidden)
    wk, bk = lin(ks[2], ks[3], input_dim, hidden)
    wv, bv = lin(ks[4], ks[5], input_dim, hidden)
    wo, bo = lin(ks[6], ks[7], hidden, embed_dim)
    return dict(
        gamma=jnp.ones((input_dim,), jnp.float32),
        beta=jnp.zeros((input_dim,), jnp.float32),
        wq=wq, bq=bq, wk=wk, bk=bk, wv=wv, bv=bv, wo=wo, bo=bo,
    )


if __name__ == "__main__":
    batch, seq_len, input_dim = 2, 8, 16
    num_head, embed_dim = 4, 32

    key = jax.random.PRNGKey(0)
    kq, kk, kv, kp = jax.random.split(key, 4)
    Q = jax.random.normal(kq, (batch, seq_len, input_dim), jnp.float32)
    K = jax.random.normal(kk, (batch, seq_len, input_dim), jnp.float32)
    V = jax.random.normal(kv, (batch, seq_len, input_dim), jnp.float32)
    params = init_params(kp, input_dim, embed_dim)

    out = multihead_forward(Q, K, V, params, num_head)
    out = jax.block_until_ready(out)

    ref = multihead_reference(Q, K, V, params, num_head)
    # Tolerance 1e-2: the only deliberate approximation vs. the exact f32
    # reference is the EUP approximate reciprocal in the softmax normalization
    # (~1e-3-level relative error); any structural bug would show as O(1) errors.
    np.testing.assert_allclose(np.asarray(out), np.asarray(ref), rtol=1e-2, atol=1e-2)

    print("KERNEL_OK")
</pallas_src>

<mosaic_0001>
module attributes {stable_mosaic.version = 11 : i64} {
  func.func @multihead_kernel(%arg0: i32, %arg1: memref<1x24x16xf32, #tpu.memory_space<vmem>>, %arg2: memref<48x128xf32, #tpu.memory_space<vmem>>, %arg3: memref<4x128xf32, #tpu.memory_space<vmem>>, %arg4: memref<1x8x128xf32, #tpu.memory_space<vmem>>) attributes {dimension_semantics = [#tpu.dimension_semantics<parallel>], iteration_bounds = array<i64: 2>, scalar_prefetch = 0 : i64, scratch_operands = 0 : i64, tpu.core_type = #tpu.core_type<tc>, window_params = [{transform_indices = @transform_0, window_bounds = array<i64: 1, 24, 16>}, {pipeline_mode = #tpu.pipeline_mode<synchronous>, transform_indices = @transform_1, window_bounds = array<i64: 48, 128>}, {pipeline_mode = #tpu.pipeline_mode<synchronous>, transform_indices = @transform_2, window_bounds = array<i64: 4, 128>}, {transform_indices = @transform_3, window_bounds = array<i64: 1, 8, 128>}]} {
    %c0 = arith.constant 0 : index
    %c0_0 = arith.constant 0 : index
    %c0_1 = arith.constant 0 : index
    %0 = vector.load %arg1[%c0, %c0_0, %c0_1] : memref<1x24x16xf32, #tpu.memory_space<vmem>>, vector<1x24x16xf32>
    %1 = vector.shape_cast %0 : vector<1x24x16xf32> to vector<24x16xf32>
    %c0_2 = arith.constant 0 : index
    %c0_3 = arith.constant 0 : index
    %2 = vector.load %arg3[%c0_2, %c0_3] : memref<4x128xf32, #tpu.memory_space<vmem>>, vector<1x16xf32>
    %c1 = arith.constant 1 : index
    %c0_4 = arith.constant 0 : index
    %3 = vector.load %arg3[%c1, %c0_4] : memref<4x128xf32, #tpu.memory_space<vmem>>, vector<1x16xf32>
    %cst = arith.constant dense<0.000000e+00> : vector<24xf32>
    %4 = vector.multi_reduction <add>, %1, %cst [1] : vector<24x16xf32> to vector<24xf32>
    %5 = vector.shape_cast %4 : vector<24xf32> to vector<24x1xf32>
    %cst_5 = arith.constant 1.600000e+01 : f32
    %6 = vector.broadcast %cst_5 : f32 to vector<24x1xf32>
    %7 = arith.divf %5, %6 : vector<24x1xf32>
    %8 = vector.broadcast %7 : vector<24x1xf32> to vector<24x16xf32>
    %9 = arith.subf %1, %8 : vector<24x16xf32>
    %10 = arith.mulf %9, %9 : vector<24x16xf32>
    %cst_6 = arith.constant dense<0.000000e+00> : vector<24xf32>
    %11 = vector.multi_reduction <add>, %10, %cst_6 [1] : vector<24x16xf32> to vector<24xf32>
    %12 = vector.shape_cast %11 : vector<24xf32> to vector<24x1xf32>
    %cst_7 = arith.constant 1.600000e+01 : f32
    %13 = vector.broadcast %cst_7 : f32 to vector<24x1xf32>
    %14 = arith.divf %12, %13 : vector<24x1xf32>
    %15 = vector.broadcast %7 : vector<24x1xf32> to vector<24x16xf32>
    %16 = arith.subf %1, %15 : vector<24x16xf32>
    %cst_8 = arith.constant 9.99999974E-6 : f32
    %17 = vector.broadcast %cst_8 : f32 to vector<24x1xf32>
    %18 = arith.addf %14, %17 : vector<24x1xf32>
    %19 = math.rsqrt %18 : vector<24x1xf32>
    %20 = vector.broadcast %19 : vector<24x1xf32> to vector<24x16xf32>
    %21 = arith.mulf %16, %20 : vector<24x16xf32>
    %22 = vector.broadcast %2 : vector<1x16xf32> to vector<24x16xf32>
    %23 = arith.mulf %21, %22 : vector<24x16xf32>
    %24 = vector.broadcast %3 : vector<1x16xf32> to vector<24x16xf32>
    %25 = arith.addf %23, %24 : vector<24x16xf32>
    %c0_9 = arith.constant 0 : index
    %c0_10 = arith.constant 0 : index
    %26 = vector.load %arg2[%c0_9, %c0_10] : memref<48x128xf32, #tpu.memory_space<vmem>>, vector<16x96xf32>
    %c2 = arith.constant 2 : index
    %c0_11 = arith.constant 0 : index
    %27 = vector.load %arg3[%c2, %c0_11] : memref<4x128xf32, #tpu.memory_space<vmem>>, vector<1x96xf32>
    %cst_12 = arith.constant dense<0.000000e+00> : vector<24x96xf32>
    %28 = tpu.matmul %25, %26, %cst_12 {dimension_numbers = #tpu.dot_dimension_numbers<[1], [0], [0], [1], [0, 0, 1, 1], [], []>} : vector<24x16xf32>, vector<16x96xf32>, vector<24x96xf32> -> vector<24x96xf32>
    %29 = vector.broadcast %27 : vector<1x96xf32> to vector<24x96xf32>
    %30 = arith.addf %28, %29 : vector<24x96xf32>
    %31 = vector.extract_strided_slice %30 {offsets = [0, 0], sizes = [8, 32], strides = [1, 1]} : vector<24x96xf32> to vector<8x32xf32>
    %32 = vector.extract_strided_slice %30 {offsets = [8, 32], sizes = [8, 32], strides = [1, 1]} : vector<24x96xf32> to vector<8x32xf32>
    %33 = vector.extract_strided_slice %30 {offsets = [16, 64], sizes = [8, 32], strides = [1, 1]} : vector<24x96xf32> to vector<8x32xf32>
    %cst_13 = arith.constant 0.000000e+00 : f32
    %34 = vector.broadcast %cst_13 : f32 to vector<8x128xf32>
    %35 = vector.extract_strided_slice %31 {offsets = [0, 0], sizes = [8, 8], strides = [1, 1]} : vector<8x32xf32> to vector<8x8xf32>
    %36 = vector.extract_strided_slice %32 {offsets = [0, 0], sizes = [8, 8], strides = [1, 1]} : vector<8x32xf32> to vector<8x8xf32>
    %37 = vector.extract_strided_slice %33 {offsets = [0, 0], sizes = [8, 8], strides = [1, 1]} : vector<8x32xf32> to vector<8x8xf32>
    %cst_14 = arith.constant dense<0.000000e+00> : vector<8x8xf32>
    %38 = tpu.matmul %35, %36, %cst_14 {dimension_numbers = #tpu.dot_dimension_numbers<[1], [1], [0], [0], [0, 0, 1, 0], [], []>} : vector<8x8xf32>, vector<8x8xf32>, vector<8x8xf32> -> vector<8x8xf32>
    %cst_15 = arith.constant dense<0xFF800000> : vector<8xf32>
    %39 = vector.multi_reduction <maximumf>, %38, %cst_15 [1] : vector<8x8xf32> to vector<8xf32>
    %40 = vector.shape_cast %39 : vector<8xf32> to vector<8x1xf32>
    %41 = vector.broadcast %40 : vector<8x1xf32> to vector<8x8xf32>
    %42 = arith.subf %38, %41 : vector<8x8xf32>
    %43 = math.exp %42 : vector<8x8xf32>
    %cst_16 = arith.constant dense<0.000000e+00> : vector<8xf32>
    %44 = vector.multi_reduction <add>, %43, %cst_16 [1] : vector<8x8xf32> to vector<8xf32>
    %45 = vector.shape_cast %44 : vector<8xf32> to vector<8x1xf32>
    %46 = tpu.reciprocal %45 {approx = true} : vector<8x1xf32> -> vector<8x1xf32>
    %47 = vector.broadcast %46 : vector<8x1xf32> to vector<8x8xf32>
    %48 = arith.mulf %43, %47 : vector<8x8xf32>
    %cst_17 = arith.constant dense<0.000000e+00> : vector<8x8xf32>
    %49 = tpu.matmul %48, %37, %cst_17 {dimension_numbers = #tpu.dot_dimension_numbers<[1], [0], [0], [1], [0, 0, 1, 1], [], []>} : vector<8x8xf32>, vector<8x8xf32>, vector<8x8xf32> -> vector<8x8xf32>
    %c16 = arith.constant 16 : index
    %c0_18 = arith.constant 0 : index
    %50 = vector.load %arg2[%c16, %c0_18] : memref<48x128xf32, #tpu.memory_space<vmem>>, vector<8x128xf32>
    %cst_19 = arith.constant dense<0.000000e+00> : vector<8x128xf32>
    %51 = tpu.matmul %49, %50, %cst_19 {dimension_numbers = #tpu.dot_dimension_numbers<[1], [0], [0], [1], [0, 0, 1, 1], [], []>} : vector<8x8xf32>, vector<8x128xf32>, vector<8x128xf32> -> vector<8x128xf32>
    %52 = arith.addf %34, %51 : vector<8x128xf32>
    %53 = vector.extract_strided_slice %31 {offsets = [0, 8], sizes = [8, 8], strides = [1, 1]} : vector<8x32xf32> to vector<8x8xf32>
    %54 = vector.extract_strided_slice %32 {offsets = [0, 8], sizes = [8, 8], strides = [1, 1]} : vector<8x32xf32> to vector<8x8xf32>
    %55 = vector.extract_strided_slice %33 {offsets = [0, 8], sizes = [8, 8], strides = [1, 1]} : vector<8x32xf32> to vector<8x8xf32>
    %cst_20 = arith.constant dense<0.000000e+00> : vector<8x8xf32>
    %56 = tpu.matmul %53, %54, %cst_20 {dimension_numbers = #tpu.dot_dimension_numbers<[1], [1], [0], [0], [0, 0, 1, 0], [], []>} : vector<8x8xf32>, vector<8x8xf32>, vector<8x8xf32> -> vector<8x8xf32>
    %cst_21 = arith.constant dense<0xFF800000> : vector<8xf32>
    %57 = vector.multi_reduction <maximumf>, %56, %cst_21 [1] : vector<8x8xf32> to vector<8xf32>
    %58 = vector.shape_cast %57 : vector<8xf32> to vector<8x1xf32>
    %59 = vector.broadcast %58 : vector<8x1xf32> to vector<8x8xf32>
    %60 = arith.subf %56, %59 : vector<8x8xf32>
    %61 = math.exp %60 : vector<8x8xf32>
    %cst_22 = arith.constant dense<0.000000e+00> : vector<8xf32>
    %62 = vector.multi_reduction <add>, %61, %cst_22 [1] : vector<8x8xf32> to vector<8xf32>
    %63 = vector.shape_cast %62 : vector<8xf32> to vector<8x1xf32>
    %64 = tpu.reciprocal %63 {approx = true} : vector<8x1xf32> -> vector<8x1xf32>
    %65 = vector.broadcast %64 : vector<8x1xf32> to vector<8x8xf32>
    %66 = arith.mulf %61, %65 : vector<8x8xf32>
    %cst_23 = arith.constant dense<0.000000e+00> : vector<8x8xf32>
    %67 = tpu.matmul %66, %55, %cst_23 {dimension_numbers = #tpu.dot_dimension_numbers<[1], [0], [0], [1], [0, 0, 1, 1], [], []>} : vector<8x8xf32>, vector<8x8xf32>, vector<8x8xf32> -> vector<8x8xf32>
    %c24 = arith.constant 24 : index
    %c0_24 = arith.constant 0 : index
    %68 = vector.load %arg2[%c24, %c0_24] : memref<48x128xf32, #tpu.memory_space<vmem>>, vector<8x128xf32>
    %cst_25 = arith.constant dense<0.000000e+00> : vector<8x128xf32>
    %69 = tpu.matmul %67, %68, %cst_25 {dimension_numbers = #tpu.dot_dimension_numbers<[1], [0], [0], [1], [0, 0, 1, 1], [], []>} : vector<8x8xf32>, vector<8x128xf32>, vector<8x128xf32> -> vector<8x128xf32>
    %70 = arith.addf %52, %69 : vector<8x128xf32>
    %71 = vector.extract_strided_slice %31 {offsets = [0, 16], sizes = [8, 8], strides = [1, 1]} : vector<8x32xf32> to vector<8x8xf32>
    %72 = vector.extract_strided_slice %32 {offsets = [0, 16], sizes = [8, 8], strides = [1, 1]} : vector<8x32xf32> to vector<8x8xf32>
    %73 = vector.extract_strided_slice %33 {offsets = [0, 16], sizes = [8, 8], strides = [1, 1]} : vector<8x32xf32> to vector<8x8xf32>
    %cst_26 = arith.constant dense<0.000000e+00> : vector<8x8xf32>
    %74 = tpu.matmul %71, %72, %cst_26 {dimension_numbers = #tpu.dot_dimension_numbers<[1], [1], [0], [0], [0, 0, 1, 0], [], []>} : vector<8x8xf32>, vector<8x8xf32>, vector<8x8xf32> -> vector<8x8xf32>
    %cst_27 = arith.constant dense<0xFF800000> : vector<8xf32>
    %75 = vector.multi_reduction <maximumf>, %74, %cst_27 [1] : vector<8x8xf32> to vector<8xf32>
    %76 = vector.shape_cast %75 : vector<8xf32> to vector<8x1xf32>
    %77 = vector.broadcast %76 : vector<8x1xf32> to vector<8x8xf32>
    %78 = arith.subf %74, %77 : vector<8x8xf32>
    %79 = math.exp %78 : vector<8x8xf32>
    %cst_28 = arith.constant dense<0.000000e+00> : vector<8xf32>
    %80 = vector.multi_reduction <add>, %79, %cst_28 [1] : vector<8x8xf32> to vector<8xf32>
    %81 = vector.shape_cast %80 : vector<8xf32> to vector<8x1xf32>
    %82 = tpu.reciprocal %81 {approx = true} : vector<8x1xf32> -> vector<8x1xf32>
    %83 = vector.broadcast %82 : vector<8x1xf32> to vector<8x8xf32>
    %84 = arith.mulf %79, %83 : vector<8x8xf32>
    %cst_29 = arith.constant dense<0.000000e+00> : vector<8x8xf32>
    %85 = tpu.matmul %84, %73, %cst_29 {dimension_numbers = #tpu.dot_dimension_numbers<[1], [0], [0], [1], [0, 0, 1, 1], [], []>} : vector<8x8xf32>, vector<8x8xf32>, vector<8x8xf32> -> vector<8x8xf32>
    %c32 = arith.constant 32 : index
    %c0_30 = arith.constant 0 : index
    %86 = vector.load %arg2[%c32, %c0_30] : memref<48x128xf32, #tpu.memory_space<vmem>>, vector<8x128xf32>
    %cst_31 = arith.constant dense<0.000000e+00> : vector<8x128xf32>
    %87 = tpu.matmul %85, %86, %cst_31 {dimension_numbers = #tpu.dot_dimension_numbers<[1], [0], [0], [1], [0, 0, 1, 1], [], []>} : vector<8x8xf32>, vector<8x128xf32>, vector<8x128xf32> -> vector<8x128xf32>
    %88 = arith.addf %70, %87 : vector<8x128xf32>
    %89 = vector.extract_strided_slice %31 {offsets = [0, 24], sizes = [8, 8], strides = [1, 1]} : vector<8x32xf32> to vector<8x8xf32>
    %90 = vector.extract_strided_slice %32 {offsets = [0, 24], sizes = [8, 8], strides = [1, 1]} : vector<8x32xf32> to vector<8x8xf32>
    %91 = vector.extract_strided_slice %33 {offsets = [0, 24], sizes = [8, 8], strides = [1, 1]} : vector<8x32xf32> to vector<8x8xf32>
    %cst_32 = arith.constant dense<0.000000e+00> : vector<8x8xf32>
    %92 = tpu.matmul %89, %90, %cst_32 {dimension_numbers = #tpu.dot_dimension_numbers<[1], [1], [0], [0], [0, 0, 1, 0], [], []>} : vector<8x8xf32>, vector<8x8xf32>, vector<8x8xf32> -> vector<8x8xf32>
    %cst_33 = arith.constant dense<0xFF800000> : vector<8xf32>
    %93 = vector.multi_reduction <maximumf>, %92, %cst_33 [1] : vector<8x8xf32> to vector<8xf32>
    %94 = vector.shape_cast %93 : vector<8xf32> to vector<8x1xf32>
    %95 = vector.broadcast %94 : vector<8x1xf32> to vector<8x8xf32>
    %96 = arith.subf %92, %95 : vector<8x8xf32>
    %97 = math.exp %96 : vector<8x8xf32>
    %cst_34 = arith.constant dense<0.000000e+00> : vector<8xf32>
    %98 = vector.multi_reduction <add>, %97, %cst_34 [1] : vector<8x8xf32> to vector<8xf32>
    %99 = vector.shape_cast %98 : vector<8xf32> to vector<8x1xf32>
    %100 = tpu.reciprocal %99 {approx = true} : vector<8x1xf32> -> vector<8x1xf32>
    %101 = vector.broadcast %100 : vector<8x1xf32> to vector<8x8xf32>
    %102 = arith.mulf %97, %101 : vector<8x8xf32>
    %cst_35 = arith.constant dense<0.000000e+00> : vector<8x8xf32>
    %103 = tpu.matmul %102, %91, %cst_35 {dimension_numbers = #tpu.dot_dimension_numbers<[1], [0], [0], [1], [0, 0, 1, 1], [], []>} : vector<8x8xf32>, vector<8x8xf32>, vector<8x8xf32> -> vector<8x8xf32>
    %c40 = arith.constant 40 : index
    %c0_36 = arith.constant 0 : index
    %104 = vector.load %arg2[%c40, %c0_36] : memref<48x128xf32, #tpu.memory_space<vmem>>, vector<8x128xf32>
    %cst_37 = arith.constant dense<0.000000e+00> : vector<8x128xf32>
    %105 = tpu.matmul %103, %104, %cst_37 {dimension_numbers = #tpu.dot_dimension_numbers<[1], [0], [0], [1], [0, 0, 1, 1], [], []>} : vector<8x8xf32>, vector<8x128xf32>, vector<8x128xf32> -> vector<8x128xf32>
    %106 = arith.addf %88, %105 : vector<8x128xf32>
    %c3 = arith.constant 3 : index
    %c0_38 = arith.constant 0 : index
    %107 = vector.load %arg3[%c3, %c0_38] : memref<4x128xf32, #tpu.memory_space<vmem>>, vector<1x128xf32>
    %108 = vector.broadcast %107 : vector<1x128xf32> to vector<8x128xf32>
    %109 = arith.addf %106, %108 : vector<8x128xf32>
    %c0_39 = arith.constant 0 : index
    %c0_40 = arith.constant 0 : index
    %c0_41 = arith.constant 0 : index
    %110 = vector.load %arg4[%c0_39, %c0_40, %c0_41] : memref<1x8x128xf32, #tpu.memory_space<vmem>>, vector<1x8x128xf32>
    %111 = vector.shape_cast %110 : vector<1x8x128xf32> to vector<8x128xf32>
    %112 = vector.shape_cast %109 : vector<8x128xf32> to vector<1x8x128xf32>
    tpu.vector_store %arg4[%c0_39, %c0_40, %c0_41], %112 {strides = array<i32>} : memref<1x8x128xf32, #tpu.memory_space<vmem>>, vector<1x8x128xf32>,
    return
  }
  func.func @transform_0(%arg0: i32) -> (i32, i32, i32) {
    %c0_i32 = arith.constant 0 : i32
    %c0_i32_0 = arith.constant 0 : i32
    %c0_i32_1 = arith.constant 0 : i32
    return %arg0, %c0_i32, %c0_i32_0 : i32, i32, i32
  }
  func.func @transform_1(%arg0: i32) -> (i32, i32) {
    %c0_i32 = arith.constant 0 : i32
    %c0_i32_0 = arith.constant 0 : i32
    %c0_i32_1 = arith.constant 0 : i32
    return %c0_i32, %c0_i32_0 : i32, i32
  }
  func.func @transform_2(%arg0: i32) -> (i32, i32) {
    %c0_i32 = arith.constant 0 : i32
    %c0_i32_0 = arith.constant 0 : i32
    %c0_i32_1 = arith.constant 0 : i32
    return %c0_i32, %c0_i32_0 : i32, i32
  }
  func.func @transform_3(%arg0: i32) -> (i32, i32, i32) {
    %c0_i32 = arith.constant 0 : i32
    %c0_i32_0 = arith.constant 0 : i32
    %c0_i32_1 = arith.constant 0 : i32
    return %arg0, %c0_i32, %c0_i32_0 : i32, i32, i32
  }
}

</mosaic_0001>

<bundles_post_ra>
// kernel: tpu_custom_call.1
= control target key start
LH: loop header
LB: loop body
LE: loop exit
PB: predicated region body
PF: predicated region fallthrough
CT: control target
= control target key end

     0   :  { %8 = vsyncpa [#allocation3], 0  ;;  %s1888_s0 = inlined_call_operand.vmem [shape: f32[2,24,16], index: 0, kind: input, shape index: {}]   ;;  %s1889_s1 = inlined_call_operand.vmem [shape: f32[48,128], index: 1, kind: input, shape index: {}]   ;;  %s1890_s2 = inlined_call_operand.vmem [shape: f32[4,128], index: 2, kind: input, shape index: {}]   ;;  %s1891_s3 = inlined_call_operand.hbm [shape: f32[2,8,128], index: 3, kind: output, shape index: {}]  }
   0x1   :  { %10 = vsyncpa [#allocation3 + $0x1], 0  ;;  %s1671_s12 = smov 0   ;;  %s1673_s13 = smov 0  }
   0x2   :  { %s1675_s14 = smov 0   ;;  %s1677_s15 = smov 0  }
   0x3 LB: > { %s1692_s16 = sadd.s32 4294967295, %s1635_s15   ;;  %s1365_s17 = sadd.s32 4294967294, %s1635_s15   ;;  %s1635_s15 = sphi %s1677_s15, %s1897_s15   ;;  %s1631_s14 = sphi %s1675_s14, %s1896_s14   ;;  %s1627_s13 = sphi %s1673_s13, %s1895_s13   ;;  %s1623_s12 = sphi %s1671_s12, %s1894_s12  }
   0x4   : > { %s1696_s18 = sadd.s32 1, %s1635_s15   ;;  %s91_s19 = sadd.s32 1, %s1631_s14 }
   0x5   : > { %s88_s20 = ssub.s32 %s1635_s15, %s1696_s18  ;;  %p101_p0 = scmp.ne.s32.totalorder %s1631_s14, %s1627_s13 }
   0x6   : > { %p89_p1 = scmp.eq.s32.totalorder %s88_s20, 0  ;;  %p102_p2 = scmp.eq.s32.totalorder %s1692_s16, 1 }
   0x7   : > { %p107_p3 = scmp.ne.s32.totalorder %s1627_s13, %s1623_s12  ;;  %p108_p4 = scmp.eq.s32.totalorder %s1365_s17, 1 }
   0x8   : > { %s1707_s21 = scalar_select %p89_p1, %s1631_s14, %s91_s19  }
   0x9   : > { %p1709_p5 = por %p102_p2, %p101_p0  ;;  %p1713_p6 = por %p108_p4, %p107_p3 }
   0xa   : > { %p1368_p7 = scmp.ge.s32.totalorder %s1635_s15, 1  ;;  %p140_p8 = scmp.lt.s32.totalorder %s1635_s15, 3 }
   0xc   : > { %p141_p9 = pnand %p1368_p7, %p140_p8 }
   0xd   : > { %p164_p10 = scmp.lt.s32.totalorder (!%p141_p9), %s1692_s16, 1  ;;  %s1639_s17 = smov (!%p141_p9), 96  }
   0xe   : > { %144 = sbr.rel (%p141_p9) target bundleno = 3278 (0xcce), region = 32  ;;  %s1640_s19 = smov (!%p141_p9), 88  }
   0xf   : > { %s1641_s20 = smov (!%p141_p9), 120   ;;  %s1644_s26 = smov (!%p141_p9), 112  }
  0x10   : > { %s1645_s27 = smov (!%p141_p9), 80   ;;  %s1646_s5 = smov (!%p141_p9), 72  }
  0x11   : > { %s1647_s6 = smov (!%p141_p9), 104   ;;  %s1648_s7 = smov (!%p141_p9), 48  }
  0x12   : > { %s1649_s10 = smov (!%p141_p9), 40  }
  0x13   : > { %s165_s24 = scalar_select %p164_p10, %s1692_s16, 1  ;;  %vm174_vm0 = vcmask 130048   ;;  %v230_v14 = vld [vmem:[%s1889_s1 + $0x8] sm:$0xff]  ;;  %v1637_v15 = vmov 0.0   ;;  %v229_v16 = vld [vmem:[%s1889_s1] sm:$0xff]  ;;  %vm1638_vm1 = vmmov 0  }
  0x14   : > { %1427 = vmatprep.subr.mxu0 %v1637_v15  ;;  %1431 = vmatprep.mubr.msk.f32.mxu0 %vm1638_vm1, %v1637_v15  ;;  %v1371_v26 = vld [vmem:[%s1890_s2] ss:$0 sm:$0xff]  ;;  %v1372_v28 = vld [vmem:[%s1890_s2 + $0x1] ss:$0 sm:$0xff]  ;;  %v1373_v44 = vld [vmem:[%s1890_s2 + $0x2] ss:$0 sm:$0xff] }
  0x15   : > { %s1500_s25 = smul.u32 24, %s165_s24  ;;  %1428 = vmatpush3.msra.mxu0 %v230_v14  ;;  %1440 = vmatprep.subr.mxu1 %v1637_v15  ;;  %vm328_vm2 = vcmask 64512   ;;  %s1642_s24 = smov 64  }
  0x16   : > { %1429 = vmatprep.subr.mxu0 %v1637_v15  ;;  %1442 = vmatprep.mubr.msk.f32.mxu1 %vm1638_vm1, %v1637_v15 }
  0x17   : > { %s1724_s28 = scalar_lea.vmem %s1888_s0, %s1500_s25  ;;  %1430 = vmatpush3.msra.mxu0 %v229_v16  ;;  %s1643_s25 = smov 56  }
  0x18   : > { %v169_v0 = vld [vmem:[%s1724_s28] sm:$0xff]  ;;  %v170_v1 = vld [vmem:[%s1724_s28 + $0x8] sm:$0xff]  ;;  %1455 = vmatprep.subr.mxu0 %v1637_v15  ;;  %v171_v17 = vld [vmem:[%s1724_s28 + $0x10] sm:$0xff] }
  0x19   : > { %v175_v2 = vsel %vm174_vm0, %v169_v0, 0.0  ;;  %v178_v3 = vsel %vm174_vm0, %v170_v1, 0.0  ;;  %v181_v18 = vsel %vm174_vm0, %v171_v17, 0.0 }
  0x1a   : > { %176 = vadd.xlane.f32.xlu0 %v175_v2 }
  0x1e   : > { %179 = vadd.xlane.f32.xlu0 %v178_v3 }
  0xa3   : > { %v177_v4 = vpop.xlane.xlu0 %176 }
  0xa4   : > { %v185_v5 = vmul.f32 0.0625, %v177_v4 }
  0xa6   : > { %v188_v6 = vsub.f32 %v169_v0, %v185_v5 }
  0xa7   : > { %v180_v7 = vpop.xlane.xlu0 %179 }
  0xa8   : > { %v186_v8 = vmul.f32 0.0625, %v180_v7  ;;  %v191_v9 = vmul.f32 %v188_v6, %v188_v6 }
  0xaa   : > { %v189_v10 = vsub.f32 %v170_v1, %v186_v8  ;;  %v194_v11 = vsel %vm174_vm0, %v191_v9, 0.0 }
  0xab   : > { %195 = vadd.xlane.f32.xlu1 %v194_v11 }
  0xac   : > { %v192_v12 = vmul.f32 %v189_v10, %v189_v10 }
  0xae   : > { %v197_v13 = vsel %vm174_vm0, %v192_v12, 0.0 }
  0xaf   : > { %198 = vadd.xlane.f32.xlu1 %v197_v13 }
  0xb3   : > { %182 = vadd.xlane.f32.xlu1 %v181_v18 }
 0x134   : > { %v196_v19 = vpop.xlane.xlu1 %195 }
 0x135   : > { %v203_v20 = vmul.f32 0.0625, %v196_v19 }
 0x137   : > { %v206_v21 = vadd.f32 1e-05, %v203_v20  ;;  %v658_v20 = vld [vmem:[%s1889_s1 + $0x18] sm:$0xff] }
 0x138   : > { %v199_v22 = vpop.xlane.xlu1 %198 }
 0x139   : > { %1553 = vrsqrt.f32 %v206_v21  ;;  %v204_v23 = vmul.f32 0.0625, %v199_v22 }
 0x13b   : > { %v207_v24 = vadd.f32 1e-05, %v204_v23 }
 0x13c   : > { %v183_v35 = vpop.xlane.xlu1 %182 }
 0x13d   : > { %1555 = vrsqrt.f32 %v207_v24  ;;  %v187_v36 = vmul.f32 0.0625, %v183_v35  ;;  %v492_v24 = vld [vmem:[%s1889_s1 + $0x10] sm:$0xff] }
 0x13f   : > { %v190_v37 = vsub.f32 %v171_v17, %v187_v36 }
 0x141   : > { %v193_v38 = vmul.f32 %v190_v37, %v190_v37 }
 0x143   : > { %v200_v39 = vsel %vm174_vm0, %v193_v38, 0.0 }
 0x144   : > { %201 = vadd.xlane.f32.xlu1 %v200_v39 }
 0x146   : > { %v1554_v25 = vpop.eup %1553 }
 0x147   : > { %v212_v27 = vmul.f32 %v1554_v25, %v188_v6 }
 0x149   : > { %v219_v29 = vmul.f32 %v1371_v26, %v212_v27 }
 0x14a   : > { %v1556_v30 = vpop.eup %1555 }
 0x14b   : > { %v226_v31 = vadd.f32 %v1372_v28, %v219_v29  ;;  %v213_v32 = vmul.f32 %v1556_v30, %v189_v10 }
 0x14d   : > { %1432 = vmatmul.mubr.msk.f32.vlgmr.msra.gmra.mxu0 %vm174_vm0, %v226_v31  ;;  %v220_v33 = vmul.f32 %v1371_v26, %v213_v32 }
 0x14e   : > { %1434 = vmatprep.mubr.msk.f32.mxu0 %vm1638_vm1, %v1637_v15 }
 0x14f   : > { %v227_v34 = vadd.f32 %v1372_v28, %v220_v33 }
 0x151   : > { %1435 = vmatmul.mubr.msk.f32.gmra.mxu0 %vm174_vm0, %v227_v34 }
 0x152   : > { %1437 = vmatprep.mubr.msk.f32.mxu0 %vm1638_vm1, %v1637_v15 }
 0x1cd   : > { %v202_v41 = vpop.xlane.xlu1 %201 }
 0x1ce   : > { %v205_v43 = vmul.f32 0.0625, %v202_v41 }
 0x1d0   : > { %v208_v46 = vadd.f32 1e-05, %v205_v43 }
 0x1d2   : > { %1557 = vrsqrt.f32 %v208_v46 }
 0x1df   : > { %v1558_v50 = vpop.eup %1557 }
 0x1e0   : > { %v214_v51 = vmul.f32 %v1558_v50, %v190_v37 }
 0x1e2   : > { %v221_v52 = vmul.f32 %v1371_v26, %v214_v51 }
 0x1e4   : > { %v228_v53 = vadd.f32 %v1372_v28, %v221_v52 }
 0x1e6   : > { %1438 = vmatmul.mubr.msk.f32.gmra.mxu0 %vm174_vm0, %v228_v53 }
 0x1e7   : > { %1457 = vmatprep.mubr.msk.f32.mxu0 %vm1638_vm1, %v1637_v15 }
 0x20d   : > { %v311_v40 = vpop.f32.mrf.mxu0 }
 0x20e   : > { %v1768_v49 = vadd.f32 %v1373_v44, %v311_v40 }
 0x20f   : > { %v1433_v42 = vpop.f32.mrf.mxu0 }
 0x211   : > { %v316_v45 = vpop.f32.mrf.mxu0 }
 0x212   : > { %v1764_v47 = vadd.f32 %v1373_v44, %v316_v45 }
 0x213   : > { %v1436_v48 = vpop.f32.mrf.mxu0 }
 0x214   : > { %326 = vrot.lane.b32.xlu0 %v1764_v47, %s1639_s17 }
 0x218   : > { %495 = vrot.lane.b32.xlu0 %v1764_v47, %s1640_s19  ;;  %s161_s19 = sand.u32 1, %s1627_s13  }
 0x21c   : > { %493 = vrot.lane.b32.xlu0 %v1768_v49, %s1641_s20  ;;  %s1369_s20 = sshll.u32 %s161_s19, 3 }
 0x286   : > { %v327_v54 = vpop.permute.xlu0 %326 }
 0x287   : > { %1441 = vmatpush3.xpose.msk.msra.mxu1 %vm328_vm2, %v327_v54 }
 0x288   : > { %1445 = vmatprep.subr.mxu1 %v1637_v15 }
 0x28a   : > { %1443 = vmatmul.mubr.msk.f32.vlgmr.msra.gmra.mxu1 %vm328_vm2, %v1768_v49  ;;  %v496_v5 = vpop.permute.xlu0 %495 }
 0x28b   : > { %1447 = vmatprep.mubr.msk.f32.mxu1 %vm1638_vm1, %v1637_v15 }
 0x28e   : > { %v494_v7 = vpop.permute.xlu0 %493 }
 0x2a6   : > { %v321_v55 = vpop.f32.mrf.mxu0 }
 0x2a7   : > { %v1782_v1 = vadd.f32 %v1373_v44, %v321_v55 }
 0x2a8   : > { %v1439_v56 = vpop.f32.mrf.mxu0 }
 0x34a   : > { %v400_v57 = vpop.f32.mrf.mxu1 }
 0x34b   : > { %v404_v58 = vsel %vm328_vm2, %v400_v57, -inf }
 0x34c   : > { %v1444_v59 = vpop.f32.mrf.mxu1  ;;  %405 = vmax.xlane.f32.xlu1 %v404_v58 }
 0x3d5   : > { %v406_v60 = vpop.xlane.xlu1 %405 }
 0x3d6   : > { %v407_v61 = vsub.f32 %v400_v57, %v406_v60 }
 0x3d8   : > { %v408_v62 = vmul.f32 1.442695, %v407_v61 }
 0x3da   : > { %1559 = vpow2.f32 %v408_v62 }
 0x3e7   : > { %v1560_v63 = vpop.eup %1559 }
 0x3e8   : > { %v410_v0 = vsel %vm328_vm2, %v1560_v63, 0.0 }
 0x3e9   : > { %411 = vadd.xlane.f32.xlu1 %v410_v0 }
 0x3fa   : > { %416 = vrot.lane.b32.xlu1 %v1782_v1, %s1642_s24 }
 0x472   : > { %v412_v2 = vpop.xlane.xlu1 %411 }
 0x473   : > { %1561 = vrcp.f32 %v412_v2 }
 0x476   : > { %v417_v3 = vpop.permute.xlu1 %416 }
 0x477   : > { %1446 = vmatpush3.msra.mxu1 %v417_v3 }
 0x478   : > { %1450 = vmatprep.subr.mxu1 %v1637_v15 }
 0x480   : > { %v1562_v4 = vpop.eup %1561 }
 0x481   : > { %v414_v6 = vmul.f32 %v1562_v4, %v1560_v63 }
 0x483   : > { %1448 = vmatmul.mubr.msk.f32.vlgmr.msra.gmra.mxu1 %vm328_vm2, %v414_v6 }
 0x484   : > { %1451 = vmatpush3.xpose.msk.msra.mxu1 %vm328_vm2, %v496_v5  ;;  %1452 = vmatprep.mubr.msk.f32.mxu1 %vm1638_vm1, %v1637_v15  ;;  %v1393_v5 = vld [vmem:[%s1890_s2 + $0x3] ss:$0 sm:$0xff] }
 0x485   : > { %1460 = vmatprep.subr.mxu1 %v1637_v15 }
 0x487   : > { %1453 = vmatmul.mubr.msk.f32.vlgmr.msra.gmra.mxu1 %vm328_vm2, %v494_v7 }
 0x488   : > { %1462 = vmatprep.mubr.msk.f32.mxu1 %vm1638_vm1, %v1637_v15  ;;  %1461 = vmatpush3.msra.mxu1 %v658_v20 }
 0x489   : > { %1470 = vmatprep.subr.mxu1 %v1637_v15 }
 0x543   : > { %v488_v8 = vpop.f32.mrf.mxu1 }
 0x545   : > { %v1449_v9 = vpop.f32.mrf.mxu1 }
 0x547   : > { %v567_v10 = vpop.f32.mrf.mxu1 }
 0x548   : > { %v571_v11 = vsel %vm328_vm2, %v567_v10, -inf }
 0x549   : > { %572 = vmax.xlane.f32.xlu0 %v571_v11  ;;  %v1454_v12 = vpop.f32.mrf.mxu1 }
 0x55f   : > { %582 = vrot.lane.b32.xlu0 %v1782_v1, %s1643_s25 }
 0x563   : > { %805 = vrot.lane.b32.xlu0 %v1768_v49, %s1644_s26  ;;  %s1395_s26 = sshll.u32 %s1692_s16, 7 }
 0x564   : > { %s1304_s4 = scalar_lea.hbm %s1891_s3, %s1395_s26 }
 0x5d2   : > { %v573_v13 = vpop.xlane.xlu0 %572 }
 0x5d3   : > { %v574_v14 = vsub.f32 %v567_v10, %v573_v13 }
 0x5d5   : > { %v575_v16 = vmul.f32 1.442695, %v574_v14 }
 0x5d6   : > { %v583_v17 = vpop.permute.xlu0 %582 }
 0x5d7   : > { %1563 = vpow2.f32 %v575_v16  ;;  %1456 = vmatpush3.msra.mxu0 %v583_v17 }
 0x5d8   : > { %1465 = vmatprep.subr.mxu0 %v1637_v15 }
 0x5da   : > { %v806_v28 = vpop.permute.xlu0 %805 }
 0x5e4   : > { %v1564_v18 = vpop.eup %1563 }
 0x5e5   : > { %v577_v19 = vsel %vm328_vm2, %v1564_v18, 0.0 }
 0x5e6   : > { %578 = vadd.xlane.f32.xlu1 %v577_v19 }
 0x5f7   : > { %807 = vrot.lane.b32.xlu1 %v1764_v47, %s1645_s27  ;;  %s163_s27 = scalar_lea.vmem [#allocation2], %s1369_s20 }
 0x5f8   : > { %s1306_s28 = sshll.u32 %s163_s27, 4  ;;  %s1307_s28 = int_to_ptr.vmem [resolvable:$true] %s1306_s28 }
 0x66f   : > { %v579_v21 = vpop.xlane.xlu1 %578 }
 0x670   : > { %1565 = vrcp.f32 %v579_v21 }
 0x673   : > { %v808_v26 = vpop.permute.xlu1 %807 }
 0x67d   : > { %v1566_v22 = vpop.eup %1565 }
 0x67e   : > { %v581_v23 = vmul.f32 %v1566_v22, %v1564_v18 }
 0x680   : > { %1458 = vmatmul.mubr.msk.f32.vlgmr.msra.gmra.mxu0 %vm328_vm2, %v581_v23 }
 0x681   : > { %1466 = vmatpush3.msra.mxu0 %v492_v24  ;;  %1467 = vmatprep.mubr.msk.f32.mxu0 %vm1638_vm1, %v1637_v15 }
 0x682   : > { %1475 = vmatprep.subr.mxu0 %v1637_v15 }
 0x684   : > { %1468 = vmatmul.mubr.msk.f32.vlgmr.msra.gmra.mxu0 %vm328_vm2, %v488_v8 }
 0x685   : > { %1477 = vmatprep.mubr.msk.f32.mxu0 %vm1638_vm1, %v1637_v15 }
 0x740   : > { %v654_v25 = vpop.f32.mrf.mxu0 }
 0x741   : > { %1463 = vmatmul.mubr.msk.f32.vlgmr.msra.gmra.mxu1 %vm328_vm2, %v654_v25 }
 0x742   : > { %1471 = vmatpush3.xpose.msk.msra.mxu1 %vm328_vm2, %v808_v26  ;;  %v1459_v27 = vpop.f32.mrf.mxu0  ;;  %1472 = vmatprep.mubr.msk.f32.mxu1 %vm1638_vm1, %v1637_v15 }
 0x743   : > { %1480 = vmatprep.subr.mxu1 %v1637_v15 }
 0x744   : > { %v801_v29 = vpop.f32.mrf.mxu0 }
 0x745   : > { %1473 = vmatmul.mubr.msk.f32.vlgmr.msra.gmra.mxu1 %vm328_vm2, %v806_v28 }
 0x746   : > { %v1469_v30 = vpop.f32.mrf.mxu0  ;;  %1482 = vmatprep.mubr.msk.f32.mxu1 %vm1638_vm1, %v1637_v15 }
 0x801   : > { %v728_v31 = vpop.f32.mrf.mxu1 }
 0x802   : > { %v802_v59 = vadd.f32 %v801_v29, %v728_v31 }
 0x803   : > { %v1464_v32 = vpop.f32.mrf.mxu1 }
 0x805   : > { %v879_v33 = vpop.f32.mrf.mxu1 }
 0x806   : > { %v883_v34 = vsel %vm328_vm2, %v879_v33, -inf }
 0x807   : > { %884 = vmax.xlane.f32.xlu1 %v883_v34  ;;  %v1474_v35 = vpop.f32.mrf.mxu1 }
 0x818   : > { %1047 = vrot.lane.b32.xlu1 %v1764_v47, %s1646_s5  ;;  %v970_v47 = vld [vmem:[%s1889_s1 + $0x20] sm:$0xff]  ;;  %s1293_s5 = scalar_lea.sflag [#allocation3], %s161_s19 }
 0x819   : > { %1481 = vmatpush3.msra.mxu1 %v970_v47 }
 0x81a   : > { %1490 = vmatprep.subr.mxu1 %v1637_v15 }
 0x81c   : > { %1045 = vrot.lane.b32.xlu1 %v1768_v49, %s1647_s6  ;;  %s1575_s6 = scalar_lea.vmem %s1307_s28, 128 }
 0x81d   : > { %p1576_p11 = scmp.ne.s32.totalorder %s1307_s28, %s1575_s6 }
 0x81f   : > { %p1577_p12 = pnand %p1576_p11, %p1709_p5 }
 0x821   : > { %p1578_p13 = pneg %p1577_p12 }
 0x890   : > { %v885_v36 = vpop.xlane.xlu1 %884 }
 0x891   : > { %v886_v37 = vsub.f32 %v879_v33, %v885_v36 }
 0x893   : > { %v887_v38 = vmul.f32 1.442695, %v886_v37 }
 0x894   : > { %v1048_v44 = vpop.permute.xlu1 %1047 }
 0x895   : > { %1567 = vpow2.f32 %v887_v38 }
 0x898   : > { %v1046_v46 = vpop.permute.xlu1 %1045 }
 0x8a2   : > { %v1568_v39 = vpop.eup %1567 }
 0x8a3   : > { %v889_v40 = vsel %vm328_vm2, %v1568_v39, 0.0 }
 0x8a4   : > { %890 = vadd.xlane.f32.xlu0 %v889_v40 }
 0x8ba   : > { %894 = vrot.lane.b32.xlu0 %v1782_v1, %s1648_s7  ;;  %s1650_s7 = smov [#allocation2]  }
 0x8bb   : > { %s1579_s8 = sshll.u32 %s1650_s7, 4  ;;  %s1580_s8 = int_to_ptr.vmem [resolvable:$false] %s1579_s8 }
 0x8bc   : > { %s1581_s16 = scalar_lea.vmem %s1580_s8, 256  ;;  %p1582_p0 = scmp.lt.s32.totalorder %s1307_s28, %s1580_s8 }
 0x8bd   : > { %p1583_p1 = scmp.lt.s32.totalorder %s1581_s16, %s1575_s6 }
 0x8bf   : > { %p1584_p2 = por %p1583_p1, %p1582_p0 }
 0x8c1   : > { %p1585_p3 = pnand %p1584_p2, %p1578_p13 }
 0x92d   : > { %v891_v41 = vpop.xlane.xlu0 %890 }
 0x92e   : > { %1569 = vrcp.f32 %v891_v41 }
 0x931   : > { %v895_v42 = vpop.permute.xlu0 %894 }
 0x932   : > { %1476 = vmatpush3.msra.mxu0 %v895_v42 }
 0x933   : > { %1485 = vmatprep.subr.mxu0 %v1637_v15 }
 0x93b   : > { %v1570_v43 = vpop.eup %1569 }
 0x93c   : > { %v893_v45 = vmul.f32 %v1570_v43, %v1568_v39 }
 0x93e   : > { %1478 = vmatmul.mubr.msk.f32.vlgmr.msra.gmra.mxu0 %vm328_vm2, %v893_v45 }
 0x93f   : > { %1486 = vmatpush3.xpose.msk.msra.mxu0 %vm328_vm2, %v1048_v44  ;;  %1487 = vmatprep.mubr.msk.f32.mxu0 %vm1638_vm1, %v1637_v15 }
 0x940   : > { %1495 = vmatprep.subr.mxu0 %v1637_v15 }
 0x942   : > { %1488 = vmatmul.mubr.msk.f32.vlgmr.msra.gmra.mxu0 %vm328_vm2, %v1046_v46 }
 0x943   : > { %1497 = vmatprep.mubr.msk.f32.mxu0 %vm1638_vm1, %v1637_v15 }
 0x9fe   : > { %v966_v48 = vpop.f32.mrf.mxu0 }
 0x9ff   : > { %1483 = vmatmul.mubr.msk.f32.vlgmr.msra.gmra.mxu1 %vm328_vm2, %v966_v48 }
 0xa00   : > { %v1479_v49 = vpop.f32.mrf.mxu0  ;;  %1492 = vmatprep.mubr.msk.f32.mxu1 %vm1638_vm1, %v1637_v15  ;;  %v1210_v15 = vld [vmem:[%s1889_s1 + $0x28] sm:$0xff] }
 0xa01   : > { %1496 = vmatpush3.msra.mxu0 %v1210_v15 }
 0xa02   : > { %v1119_v50 = vpop.f32.mrf.mxu0 }
 0xa03   : > { %v1123_v51 = vsel %vm328_vm2, %v1119_v50, -inf }
 0xa04   : > { %1124 = vmax.xlane.f32.xlu0 %v1123_v51  ;;  %v1489_v52 = vpop.f32.mrf.mxu0 }
 0xa1a   : > { %1134 = vrot.lane.b32.xlu0 %v1782_v1, %s1649_s10 }
 0xa8d   : > { %v1125_v53 = vpop.xlane.xlu0 %1124 }
 0xa8e   : > { %v1126_v54 = vsub.f32 %v1119_v50, %v1125_v53 }
 0xa90   : > { %v1127_v55 = vmul.f32 1.442695, %v1126_v54 }
 0xa91   : > { %v1135_v56 = vpop.permute.xlu0 %1134 }
 0xa92   : > { %1571 = vpow2.f32 %v1127_v55  ;;  %1491 = vmatpush3.msra.mxu1 %v1135_v56 }
 0xa9f   : > { %v1572_v57 = vpop.eup %1571 }
 0xaa0   : > { %v1129_v58 = vsel %vm328_vm2, %v1572_v57, 0.0 }
 0xaa1   : > { %1130 = vadd.xlane.f32.xlu1 %v1129_v58 }
 0xabf   : > { %v1040_v60 = vpop.f32.mrf.mxu1 }
 0xac0   : > { %v1044_v61 = vadd.f32 %v1040_v60, %v802_v59 }
 0xac1   : > { %v1484_v62 = vpop.f32.mrf.mxu1 }
 0xb2a   : > { %v1131_v63 = vpop.xlane.xlu1 %1130 }
 0xb2b   : > { %1573 = vrcp.f32 %v1131_v63 }
 0xb38   : > { %v1574_v0 = vpop.eup %1573 }
 0xb39   : > { %v1133_v1 = vmul.f32 %v1574_v0, %v1572_v57 }
 0xb3b   : > { %1493 = vmatmul.mubr.msk.f32.vlgmr.msra.gmra.mxu1 %vm328_vm2, %v1133_v1 }
 0xbfb   : > { %v1206_v2 = vpop.f32.mrf.mxu1 }
 0xbfc   : > { %1498 = vmatmul.mubr.msk.f32.vlgmr.msra.gmra.mxu0 %vm328_vm2, %v1206_v2 }
 0xbfd   : > { %v1494_v3 = vpop.f32.mrf.mxu1 }
 0xcbc   : > { %v1280_v4 = vpop.f32.mrf.mxu0 }
 0xcbd   : > { %v1284_v6 = vadd.f32 %v1280_v4, %v1044_v61 }
 0xcbe   : > { %v1499_v7 = vpop.f32.mrf.mxu0 }
 0xcbf   : > { %v1290_v8 = vadd.f32 %v1393_v5, %v1284_v6 }
 0xcc1   : > { %1291 = vst [vmem:[%s163_s27] sm:$0xff] %v1290_v8 }
 0xcc2   : > { %1588 = shalt.err (!%p1585_p3)
}
 0xcc3   : > { %s1589_s9 = scalar_lea.hbm %s1304_s4, 128  ;;  %s1593_s17 = scalar_lea.hbm %s1891_s3, 256 }
 0xcc4   : > { %p1590_p4 = scmp.ne.s32.totalorder %s1304_s4, %s1589_s9  ;;  %p1594_p9 = scmp.lt.s32.totalorder %s1304_s4, %s1891_s3 }
 0xcc5   : > { %p1595_p10 = scmp.lt.s32.totalorder %s1593_s17, %s1589_s9 }
 0xcc6   : > { %p1591_p7 = pnand %p1590_p4, %p1709_p5 }
 0xcc7   : > { %p1596_p11 = por %p1595_p10, %p1594_p9 }
 0xcc8   : > { %p1592_p8 = pneg %p1591_p7 }
 0xcca   : > { %p1597_p12 = pnand %p1596_p11, %p1592_p8 }
 0xccc   : > { %1600 = shalt.err (!%p1597_p12)
}
 0xccd   : > { %1501 = dma.vmem_to_hbm [thread:$0]  (%p1709_p5), %s1307_s28, 128, %s1304_s4, %s1293_s5  }
 0xcce PF: > { %p1507_p13 = scmp.ge.s32.totalorder %s1635_s15, 2  ;;  %s1318_s24 = sand.u32 1, %s1623_s12  }
 0xccf   : > { %s1319_s25 = scalar_lea.sflag [#allocation3], %s1318_s24 }
 0xcd0   : > { %p1504_p0 = pnand %p1507_p13, %p1713_p6 }
 0xcd2   : > { %p1505_p1 = pneg %p1504_p0 }
 0xcd4   : > { %1618 = dma.done.wait (%p1505_p1), %s1319_s25, 128  }
 0xcd5   : > { %1620 = vsyncadd (%p1505_p1), %s1319_s25, 4294967168  ;;  %p13_p2 = scmp.ge.s32.totalorder %s1696_s18, 4   ;;  %s1894_s12 = smov %s1627_s13 }
 0xcd6   : > { %s1895_s13 = smov %s1631_s14  ;;  %s1896_s14 = smov %s1707_s21 }
 0xcd7   : > { %s1897_s15 = smov %s1696_s18  ;;  %15 = sbr.rel (!%p13_p2) target bundleno = 3 (0x3), region = 67 }
 0xcdc   :  { %1324 = vsyncpa [#allocation3], 1 }
 0xcdd   :  { %1326 = vsyncpa [#allocation3 + $0x1], 1 }

</bundles_post_ra>
